<compile_context>
chip_gen: v7x
topology: tpu7x:2x2x1
jax: 0.10.0
libtpu: 0.0.40
codegen_flags: <defaults>
</compile_context>

<pallas_src>
import math
import functools

import jax
import jax.numpy as jnp
from jax.experimental import pallas as pl
from jax.experimental.pallas import tpu as pltpu


def _mha_kernel(x_ref, wq_ref, wk_ref, wv_ref, bq_ref, bk_ref, bv_ref,
                wo_ref, bo_ref, o_ref):
    # x_ref block: (1, E, L) for one batch element (PyTorch layout, no wrapper
    # transpose).
    H, E, D = wq_ref.shape
    L = x_ref.shape[2]

    # (E, L) -> (L, E) once on the small VMEM tile (XLU), replacing a full
    # HBM-pass transpose in the wrapper.
    x_le = jnp.transpose(x_ref[0], (1, 0))                                  # (L, E)

    # Broadcast activations across heads -> (H, L, E) so every stage is a single
    # batched contraction (leading-dim broadcast: no lane/sublane movement).
    xh = jnp.broadcast_to(x_le, (H, L, E))

    # Per-head projections. 1/sqrt(D) scaling is already folded into wq/bq.
    q = jnp.einsum('hle,hed->hld', xh, wq_ref[...],
                   preferred_element_type=jnp.float32) + bq_ref[...]        # (H, L, D)
    k = jnp.einsum('hle,hed->hld', xh, wk_ref[...],
                   preferred_element_type=jnp.float32) + bk_ref[...]        # (H, L, D)
    v = jnp.einsum('hle,hed->hld', xh, wv_ref[...],
                   preferred_element_type=jnp.float32) + bv_ref[...]        # (H, L, D)

    # Scores + softmax, batched over heads (trans_b contraction -> MXU native).
    s = jnp.einsum('hld,hmd->hlm', q, k,
                   preferred_element_type=jnp.float32)                      # (H, L, L)
    s = s - jnp.max(s, axis=-1, keepdims=True)
    p = jnp.exp(s)
    p = p * pl.reciprocal(jnp.sum(p, axis=-1, keepdims=True), approx=True)

    # Weighted values, then per-head output projection reduced over heads with a
    # cheap leading-dim sum (avoids concatenating along the lane axis).
    o = jnp.einsum('hlm,hmd->hld', p, v,
                   preferred_element_type=jnp.float32)                      # (H, L, D)
    out_h = jnp.einsum('hld,hde->hle', o, wo_ref[...],
                       preferred_element_type=jnp.float32)                  # (H, L, E)
    out_le = jnp.sum(out_h, axis=0) + bo_ref[...]                           # (L, E)

    # (L, E) -> (E, L): write the PyTorch layout directly (no wrapper transpose).
    o_ref[0] = jnp.transpose(out_le, (1, 0))


@functools.partial(jax.jit, static_argnames="n_head")
def sim_attention(x_bel, w_in, b_in, w_out, b_out, *, n_head):
    """x_bel: (B, E, L) -> (B, E, L)  (same semantics as SimAttention.forward).

    w_in  : (E, 3E)  pre-transposed joint in-projection (y = x @ W + b).
            (PyTorch stores in_proj_weight as (3E, E); pass its transpose.)
    b_in  : (1, 3E)
    w_out : (E, E)   pre-transposed out-projection.
    b_out : (1, E)
    """
    B, E, L = x_bel.shape
    assert E % n_head == 0, "embed_dim must be divisible by num_heads"
    assert w_in.shape == (E, 3 * E) and w_out.shape == (E, E)
    D = E // n_head
    scale = 1.0 / math.sqrt(D)

    # One-time, wrapper-side per-head split of the (tiny) parameters. The
    # 1/sqrt(D) scaling is folded into the q weights/bias (free).
    wq = jnp.transpose(w_in[:, 0 * E:1 * E].reshape(E, n_head, D), (1, 0, 2)) * scale
    wk = jnp.transpose(w_in[:, 1 * E:2 * E].reshape(E, n_head, D), (1, 0, 2))
    wv = jnp.transpose(w_in[:, 2 * E:3 * E].reshape(E, n_head, D), (1, 0, 2))
    bq = b_in[0, 0 * E:1 * E].reshape(n_head, 1, D) * scale
    bk = b_in[0, 1 * E:2 * E].reshape(n_head, 1, D)
    bv = b_in[0, 2 * E:3 * E].reshape(n_head, 1, D)
    wo = w_out.reshape(n_head, D, E)                       # (H, D, E)

    const3 = lambda b: (0, 0, 0)
    out_bel = pl.pallas_call(
        _mha_kernel,
        out_shape=jax.ShapeDtypeStruct((B, E, L), jnp.float32),
        grid_spec=pltpu.PrefetchScalarGridSpec(
            num_scalar_prefetch=0,
            grid=(B,),
            in_specs=[
                pl.BlockSpec((1, E, L), lambda b: (b, 0, 0)),       # x (PyTorch layout)
                pl.BlockSpec((n_head, E, D), const3),               # Wq (scaled)
                pl.BlockSpec((n_head, E, D), const3),               # Wk
                pl.BlockSpec((n_head, E, D), const3),               # Wv
                pl.BlockSpec((n_head, 1, D), const3),               # bq (scaled)
                pl.BlockSpec((n_head, 1, D), const3),               # bk
                pl.BlockSpec((n_head, 1, D), const3),               # bv
                pl.BlockSpec((n_head, D, E), const3),               # W_out
                pl.BlockSpec((1, E), lambda b: (0, 0)),             # b_out
            ],
            out_specs=pl.BlockSpec((1, E, L), lambda b: (b, 0, 0)),
        ),
        compiler_params=pltpu.CompilerParams(
            dimension_semantics=("parallel",)),
    )(x_bel, wq, wk, wv, bq, bk, bv, wo, b_out)

    return out_bel                                         # (B, E, L)


def _reference(x_bel, w_in, b_in, w_out, b_out, n_head):
    """Pure-JAX reference replicating nn.MultiheadAttention self-attention."""
    B, E, L = x_bel.shape
    D = E // n_head
    x = jnp.transpose(x_bel, (0, 2, 1))                        # (B, L, E)
    qkv = x @ w_in + b_in[0]                                   # (B, L, 3E)
    q, k, v = jnp.split(qkv, 3, axis=-1)
    q = q.reshape(B, L, n_head, D).transpose(0, 2, 1, 3) / math.sqrt(D)
    k = k.reshape(B, L, n_head, D).transpose(0, 2, 1, 3)
    v = v.reshape(B, L, n_head, D).transpose(0, 2, 1, 3)
    s = jnp.einsum("bhqd,bhkd->bhqk", q, k)
    p = jax.nn.softmax(s, axis=-1)
    o = jnp.einsum("bhqk,bhkd->bhqd", p, v)
    o = o.transpose(0, 2, 1, 3).reshape(B, L, E)
    y = o @ w_out + b_out[0]
    return jnp.transpose(y, (0, 2, 1))                         # (B, E, L)


if __name__ == "__main__":
    B, E, L, N_HEAD = 2, 32, 8, 4

    key = jax.random.PRNGKey(0)
    kx, k1, k2, k3, k4 = jax.random.split(key, 5)

    # Input in PyTorch layout (B, n_embd, seq).
    x = jax.random.normal(kx, (B, E, L), dtype=jnp.float32)

    # MultiheadAttention parameters (stored pre-transposed: y = x @ W + b).
    w_in = jax.random.normal(k1, (E, 3 * E), dtype=jnp.float32) / math.sqrt(E)
    b_in = jax.random.normal(k2, (1, 3 * E), dtype=jnp.float32) * 0.01
    w_out = jax.random.normal(k3, (E, E), dtype=jnp.float32) / math.sqrt(E)
    b_out = jax.random.normal(k4, (1, E), dtype=jnp.float32) * 0.01

    y = sim_attention(x, w_in, b_in, w_out, b_out, n_head=N_HEAD)
    y = jax.block_until_ready(y)

    y_ref = _reference(x, w_in, b_in, w_out, b_out, N_HEAD)
    assert y.shape == (B, E, L)
    # Tolerance loosened (approx reciprocal in the softmax denominator).
    assert jnp.allclose(y, y_ref, atol=1e-2, rtol=1e-2), (
        float(jnp.max(jnp.abs(y - y_ref))))

    print("KERNEL_OK")
</pallas_src>

<mosaic_0001>
module attributes {stable_mosaic.version = 11 : i64} {
  func.func @_mha_kernel(%arg0: i32, %arg1: memref<1x32x8xf32, #tpu.memory_space<vmem>>, %arg2: memref<4x32x8xf32, #tpu.memory_space<vmem>>, %arg3: memref<4x32x8xf32, #tpu.memory_space<vmem>>, %arg4: memref<4x32x8xf32, #tpu.memory_space<vmem>>, %arg5: memref<4x1x8xf32, #tpu.memory_space<vmem>>, %arg6: memref<4x1x8xf32, #tpu.memory_space<vmem>>, %arg7: memref<4x1x8xf32, #tpu.memory_space<vmem>>, %arg8: memref<4x8x32xf32, #tpu.memory_space<vmem>>, %arg9: memref<1x32xf32, #tpu.memory_space<vmem>>, %arg10: memref<1x32x8xf32, #tpu.memory_space<vmem>>) attributes {dimension_semantics = [#tpu.dimension_semantics<parallel>], iteration_bounds = array<i64: 2>, scalar_prefetch = 0 : i64, scratch_operands = 0 : i64, tpu.core_type = #tpu.core_type<tc>, window_params = [{transform_indices = @transform_0, window_bounds = array<i64: 1, 32, 8>}, {pipeline_mode = #tpu.pipeline_mode<synchronous>, transform_indices = @transform_1, window_bounds = array<i64: 4, 32, 8>}, {pipeline_mode = #tpu.pipeline_mode<synchronous>, transform_indices = @transform_2, window_bounds = array<i64: 4, 32, 8>}, {pipeline_mode = #tpu.pipeline_mode<synchronous>, transform_indices = @transform_3, window_bounds = array<i64: 4, 32, 8>}, {pipeline_mode = #tpu.pipeline_mode<synchronous>, transform_indices = @transform_4, window_bounds = array<i64: 4, 1, 8>}, {pipeline_mode = #tpu.pipeline_mode<synchronous>, transform_indices = @transform_5, window_bounds = array<i64: 4, 1, 8>}, {pipeline_mode = #tpu.pipeline_mode<synchronous>, transform_indices = @transform_6, window_bounds = array<i64: 4, 1, 8>}, {pipeline_mode = #tpu.pipeline_mode<synchronous>, transform_indices = @transform_7, window_bounds = array<i64: 4, 8, 32>}, {pipeline_mode = #tpu.pipeline_mode<synchronous>, transform_indices = @transform_8, window_bounds = array<i64: 1, 32>}, {transform_indices = @transform_9, window_bounds = array<i64: 1, 32, 8>}]} {
    %c0 = arith.constant 0 : index
    %c0_0 = arith.constant 0 : index
    %c0_1 = arith.constant 0 : index
    %0 = vector.load %arg1[%c0, %c0_0, %c0_1] : memref<1x32x8xf32, #tpu.memory_space<vmem>>, vector<1x32x8xf32>
    %1 = vector.shape_cast %0 : vector<1x32x8xf32> to vector<32x8xf32>
    %2 = tpu.transpose %1, [1, 0] : vector<32x8xf32> -> vector<8x32xf32>
    %3 = vector.shape_cast %2 : vector<8x32xf32> to vector<1x8x32xf32>
    %4 = vector.broadcast %3 : vector<1x8x32xf32> to vector<4x8x32xf32>
    %c0_2 = arith.constant 0 : index
    %c0_3 = arith.constant 0 : index
    %c0_4 = arith.constant 0 : index
    %5 = vector.load %arg2[%c0_2, %c0_3, %c0_4] : memref<4x32x8xf32, #tpu.memory_space<vmem>>, vector<4x32x8xf32>
    "tpu.trace_start"() <{level = 10 : i32, message = "hle,hed->hld"}> : () -> ()
    %cst = arith.constant dense<0.000000e+00> : vector<4x8x8xf32>
    %6 = tpu.matmul %4, %5, %cst {dimension_numbers = #tpu.dot_dimension_numbers<[2], [1], [1], [2], [0, 0, 0, 1, 1, 2], [0], [0]>} : vector<4x8x32xf32>, vector<4x32x8xf32>, vector<4x8x8xf32> -> vector<4x8x8xf32>
    "tpu.trace_stop"() : () -> ()
    %c0_5 = arith.constant 0 : index
    %c0_6 = arith.constant 0 : index
    %c0_7 = arith.constant 0 : index
    %7 = vector.load %arg5[%c0_5, %c0_6, %c0_7] : memref<4x1x8xf32, #tpu.memory_space<vmem>>, vector<4x1x8xf32>
    %8 = vector.broadcast %7 : vector<4x1x8xf32> to vector<4x8x8xf32>
    %9 = arith.addf %6, %8 : vector<4x8x8xf32>
    %c0_8 = arith.constant 0 : index
    %c0_9 = arith.constant 0 : index
    %c0_10 = arith.constant 0 : index
    %10 = vector.load %arg3[%c0_8, %c0_9, %c0_10] : memref<4x32x8xf32, #tpu.memory_space<vmem>>, vector<4x32x8xf32>
    "tpu.trace_start"() <{level = 10 : i32, message = "hle,hed->hld"}> : () -> ()
    %cst_11 = arith.constant dense<0.000000e+00> : vector<4x8x8xf32>
    %11 = tpu.matmul %4, %10, %cst_11 {dimension_numbers = #tpu.dot_dimension_numbers<[2], [1], [1], [2], [0, 0, 0, 1, 1, 2], [0], [0]>} : vector<4x8x32xf32>, vector<4x32x8xf32>, vector<4x8x8xf32> -> vector<4x8x8xf32>
    "tpu.trace_stop"() : () -> ()
    %c0_12 = arith.constant 0 : index
    %c0_13 = arith.constant 0 : index
    %c0_14 = arith.constant 0 : index
    %12 = vector.load %arg6[%c0_12, %c0_13, %c0_14] : memref<4x1x8xf32, #tpu.memory_space<vmem>>, vector<4x1x8xf32>
    %13 = vector.broadcast %12 : vector<4x1x8xf32> to vector<4x8x8xf32>
    %14 = arith.addf %11, %13 : vector<4x8x8xf32>
    %c0_15 = arith.constant 0 : index
    %c0_16 = arith.constant 0 : index
    %c0_17 = arith.constant 0 : index
    %15 = vector.load %arg4[%c0_15, %c0_16, %c0_17] : memref<4x32x8xf32, #tpu.memory_space<vmem>>, vector<4x32x8xf32>
    "tpu.trace_start"() <{level = 10 : i32, message = "hle,hed->hld"}> : () -> ()
    %cst_18 = arith.constant dense<0.000000e+00> : vector<4x8x8xf32>
    %16 = tpu.matmul %4, %15, %cst_18 {dimension_numbers = #tpu.dot_dimension_numbers<[2], [1], [1], [2], [0, 0, 0, 1, 1, 2], [0], [0]>} : vector<4x8x32xf32>, vector<4x32x8xf32>, vector<4x8x8xf32> -> vector<4x8x8xf32>
    "tpu.trace_stop"() : () -> ()
    %c0_19 = arith.constant 0 : index
    %c0_20 = arith.constant 0 : index
    %c0_21 = arith.constant 0 : index
    %17 = vector.load %arg7[%c0_19, %c0_20, %c0_21] : memref<4x1x8xf32, #tpu.memory_space<vmem>>, vector<4x1x8xf32>
    %18 = vector.broadcast %17 : vector<4x1x8xf32> to vector<4x8x8xf32>
    %19 = arith.addf %16, %18 : vector<4x8x8xf32>
    "tpu.trace_start"() <{level = 10 : i32, message = "hld,hmd->hlm"}> : () -> ()
    %cst_22 = arith.constant dense<0.000000e+00> : vector<4x8x8xf32>
    %20 = tpu.matmul %9, %14, %cst_22 {dimension_numbers = #tpu.dot_dimension_numbers<[2], [2], [1], [1], [0, 0, 0, 1, 1, 1], [0], [0]>} : vector<4x8x8xf32>, vector<4x8x8xf32>, vector<4x8x8xf32> -> vector<4x8x8xf32>
    "tpu.trace_stop"() : () -> ()
    %cst_23 = arith.constant dense<0xFF800000> : vector<4x8xf32>
    %21 = vector.multi_reduction <maximumf>, %20, %cst_23 [2] : vector<4x8x8xf32> to vector<4x8xf32>
    %22 = vector.shape_cast %21 : vector<4x8xf32> to vector<4x8x1xf32>
    %23 = vector.broadcast %22 : vector<4x8x1xf32> to vector<4x8x8xf32>
    %24 = arith.subf %20, %23 : vector<4x8x8xf32>
    %25 = math.exp %24 : vector<4x8x8xf32>
    %cst_24 = arith.constant dense<0.000000e+00> : vector<4x8xf32>
    %26 = vector.multi_reduction <add>, %25, %cst_24 [2] : vector<4x8x8xf32> to vector<4x8xf32>
    %27 = vector.shape_cast %26 : vector<4x8xf32> to vector<4x8x1xf32>
    %28 = tpu.reciprocal %27 {approx = true} : vector<4x8x1xf32> -> vector<4x8x1xf32>
    %29 = vector.broadcast %28 : vector<4x8x1xf32> to vector<4x8x8xf32>
    %30 = arith.mulf %25, %29 : vector<4x8x8xf32>
    "tpu.trace_start"() <{level = 10 : i32, message = "hlm,hmd->hld"}> : () -> ()
    %cst_25 = arith.constant dense<0.000000e+00> : vector<4x8x8xf32>
    %31 = tpu.matmul %30, %19, %cst_25 {dimension_numbers = #tpu.dot_dimension_numbers<[2], [1], [1], [2], [0, 0, 0, 1, 1, 2], [0], [0]>} : vector<4x8x8xf32>, vector<4x8x8xf32>, vector<4x8x8xf32> -> vector<4x8x8xf32>
    "tpu.trace_stop"() : () -> ()
    %c0_26 = arith.constant 0 : index
    %c0_27 = arith.constant 0 : index
    %c0_28 = arith.constant 0 : index
    %32 = vector.load %arg8[%c0_26, %c0_27, %c0_28] : memref<4x8x32xf32, #tpu.memory_space<vmem>>, vector<4x8x32xf32>
    "tpu.trace_start"() <{level = 10 : i32, message = "hld,hde->hle"}> : () -> ()
    %cst_29 = arith.constant dense<0.000000e+00> : vector<4x8x32xf32>
    %33 = tpu.matmul %31, %32, %cst_29 {dimension_numbers = #tpu.dot_dimension_numbers<[2], [1], [1], [2], [0, 0, 0, 1, 1, 2], [0], [0]>} : vector<4x8x8xf32>, vector<4x8x32xf32>, vector<4x8x32xf32> -> vector<4x8x32xf32>
    "tpu.trace_stop"() : () -> ()
    %cst_30 = arith.constant dense<0.000000e+00> : vector<8x32xf32>
    %34 = vector.multi_reduction <add>, %33, %cst_30 [0] : vector<4x8x32xf32> to vector<8x32xf32>
    %c0_31 = arith.constant 0 : index
    %c0_32 = arith.constant 0 : index
    %35 = vector.load %arg9[%c0_31, %c0_32] : memref<1x32xf32, #tpu.memory_space<vmem>>, vector<1x32xf32>
    %36 = vector.broadcast %35 : vector<1x32xf32> to vector<8x32xf32>
    %37 = arith.addf %34, %36 : vector<8x32xf32>
    %38 = tpu.transpose %37, [1, 0] : vector<8x32xf32> -> vector<32x8xf32>
    %c0_33 = arith.constant 0 : index
    %c0_34 = arith.constant 0 : index
    %c0_35 = arith.constant 0 : index
    %39 = vector.load %arg10[%c0_33, %c0_34, %c0_35] : memref<1x32x8xf32, #tpu.memory_space<vmem>>, vector<1x32x8xf32>
    %40 = vector.shape_cast %39 : vector<1x32x8xf32> to vector<32x8xf32>
    %41 = vector.shape_cast %38 : vector<32x8xf32> to vector<1x32x8xf32>
    tpu.vector_store %arg10[%c0_33, %c0_34, %c0_35], %41 {strides = array<i32>} : memref<1x32x8xf32, #tpu.memory_space<vmem>>, vector<1x32x8xf32>,
    return
  }
  func.func @transform_0(%arg0: i32) -> (i32, i32, i32) {
    %c0_i32 = arith.constant 0 : i32
    %c0_i32_0 = arith.constant 0 : i32
    %c0_i32_1 = arith.constant 0 : i32
    return %arg0, %c0_i32, %c0_i32_0 : i32, i32, i32
  }
  func.func @transform_1(%arg0: i32) -> (i32, i32, i32) {
    %c0_i32 = arith.constant 0 : i32
    %c0_i32_0 = arith.constant 0 : i32
    %c0_i32_1 = arith.constant 0 : i32
    %c0_i32_2 = arith.constant 0 : i32
    return %c0_i32, %c0_i32_0, %c0_i32_1 : i32, i32, i32
  }
  func.func @transform_2(%arg0: i32) -> (i32, i32, i32) {
    %c0_i32 = arith.constant 0 : i32
    %c0_i32_0 = arith.constant 0 : i32
    %c0_i32_1 = arith.constant 0 : i32
    %c0_i32_2 = arith.constant 0 : i32
    return %c0_i32, %c0_i32_0, %c0_i32_1 : i32, i32, i32
  }
  func.func @transform_3(%arg0: i32) -> (i32, i32, i32) {
    %c0_i32 = arith.constant 0 : i32
    %c0_i32_0 = arith.constant 0 : i32
    %c0_i32_1 = arith.constant 0 : i32
    %c0_i32_2 = arith.constant 0 : i32
    return %c0_i32, %c0_i32_0, %c0_i32_1 : i32, i32, i32
  }
  func.func @transform_4(%arg0: i32) -> (i32, i32, i32) {
    %c0_i32 = arith.constant 0 : i32
    %c0_i32_0 = arith.constant 0 : i32
    %c0_i32_1 = arith.constant 0 : i32
    %c0_i32_2 = arith.constant 0 : i32
    return %c0_i32, %c0_i32_0, %c0_i32_1 : i32, i32, i32
  }
  func.func @transform_5(%arg0: i32) -> (i32, i32, i32) {
    %c0_i32 = arith.constant 0 : i32
    %c0_i32_0 = arith.constant 0 : i32
    %c0_i32_1 = arith.constant 0 : i32
    %c0_i32_2 = arith.constant 0 : i32
    return %c0_i32, %c0_i32_0, %c0_i32_1 : i32, i32, i32
  }
  func.func @transform_6(%arg0: i32) -> (i32, i32, i32) {
    %c0_i32 = arith.constant 0 : i32
    %c0_i32_0 = arith.constant 0 : i32
    %c0_i32_1 = arith.constant 0 : i32
    %c0_i32_2 = arith.constant 0 : i32
    return %c0_i32, %c0_i32_0, %c0_i32_1 : i32, i32, i32
  }
  func.func @transform_7(%arg0: i32) -> (i32, i32, i32) {
    %c0_i32 = arith.constant 0 : i32
    %c0_i32_0 = arith.constant 0 : i32
    %c0_i32_1 = arith.constant 0 : i32
    %c0_i32_2 = arith.constant 0 : i32
    return %c0_i32, %c0_i32_0, %c0_i32_1 : i32, i32, i32
  }
  func.func @transform_8(%arg0: i32) -> (i32, i32) {
    %c0_i32 = arith.constant 0 : i32
    %c0_i32_0 = arith.constant 0 : i32
    %c0_i32_1 = arith.constant 0 : i32
    return %c0_i32, %c0_i32_0 : i32, i32
  }
  func.func @transform_9(%arg0: i32) -> (i32, i32, i32) {
    %c0_i32 = arith.constant 0 : i32
    %c0_i32_0 = arith.constant 0 : i32
    %c0_i32_1 = arith.constant 0 : i32
    return %arg0, %c0_i32, %c0_i32_0 : i32, i32, i32
  }
}

</mosaic_0001>

<bundles_post_ra>
// kernel: squeeze.5
= control target key start
LH: loop header
LB: loop body
LE: loop exit
PB: predicated region body
PF: predicated region fallthrough
CT: control target
= control target key end

     0   :  { %s37_s8 = smov 104   ;;  %vm7_vm0 = vcmask 64512   ;;  %s38_s9 = smov 112   ;;  %s55_s0 = inlined_call_operand.vmem [shape: f32[32], index: 0, kind: input, shape index: {}]   ;;  %s56_s1 = inlined_call_operand.vmem [shape: f32[4,1,8], index: 1, kind: output, shape index: {}]  }
   0x1   :  { %v4_v0 = vld [vmem:[%s55_s0] sm:$0x1]  ;;  %s36_s0 = smov 120  }
   0x2   :  { %5 = vst [vmem:[#allocation1] sm:$0x1] %v4_v0 }
   0x9   :  { %v9_v1 = vld [vmem:[#allocation1] sm:$0x1]  }
   0xa   :  { %v21_v2 = vld [vmem:[#allocation1] sm:$0x1]   ;;  %10 = vrot.lane.b32.xlu0 %v9_v1, %s36_s0 }
   0xb   :  { %22 = vrot.lane.b32.xlu1 %v21_v2, %s37_s8  ;;  %v6_v3 = vld [vmem:[#allocation1] sm:$0x1]  }
   0xc   :  { %v15_v4 = vld [vmem:[#allocation1] sm:$0x1]   ;;  %8 = vst.msk [vmem:[#allocation0] sm:$0x1] %vm7_vm0, %v6_v3  }
   0xe   :  { %16 = vrot.lane.b32.xlu0 %v15_v4, %s38_s9 }
  0x7c   :  { %v11_v5 = vpop.permute.xlu0 %10  }
  0x7d   :  { %v23_v6 = vpop.permute.xlu1 %22   ;;  %14 = vst.msk [vmem:[#allocation0 + $0x1] sm:$0x1] %vm7_vm0, %v11_v5  }
  0x7e   :  { %26 = vst.msk [vmem:[#allocation0 + $0x3] sm:$0x1] %vm7_vm0, %v23_v6  }
  0x80   :  { %v17_v7 = vpop.permute.xlu0 %16  }
  0x81   :  { %20 = vst.msk [vmem:[#allocation0 + $0x2] sm:$0x1] %vm7_vm0, %v17_v7  }
  0x88   :  { %v30_v8 = vld [vmem:[#allocation0] sm:$0xf] }
  0x89   :  { %32 = vst [vmem:[%s56_s1] sm:$0xf] %v30_v8 }

// kernel: sim_attention.1
= control target key start
LH: loop header
LB: loop body
LE: loop exit
PB: predicated region body
PF: predicated region fallthrough
CT: control target
= control target key end

     0   :  { %s2878_s30 = smov 0   ;;  %s3242_s0 = inlined_call_operand.vmem [shape: f32[2,32,8], index: 0, kind: input, shape index: {}]   ;;  %s3243_s1 = inlined_call_operand.vmem [shape: f32[4,32,8], index: 1, kind: input, shape index: {}]   ;;  %s3244_s2 = inlined_call_operand.vmem [shape: f32[4,32,8], index: 2, kind: input, shape index: {}]   ;;  %s3245_s3 = inlined_call_operand.vmem [shape: f32[4,32,8], index: 3, kind: input, shape index: {}]   ;;  %s3246_s4 = inlined_call_operand.vmem [shape: f32[4,1,8], index: 4, kind: input, shape index: {}]   ;;  %s3247_s5 = inlined_call_operand.vmem [shape: f32[4,1,8], index: 5, kind: input, shape index: {}]   ;;  %s3248_s6 = inlined_call_operand.vmem [shape: f32[4,1,8], index: 6, kind: input, shape index: {}]   ;;  %s3249_s7 = inlined_call_operand.vmem [shape: f32[4,8,32], index: 7, kind: input, shape index: {}]   ;;  %s3250_s8 = inlined_call_operand.vmem [shape: f32[1,32], index: 8, kind: input, shape index: {}]   ;;  %s3251_s9 = inlined_call_operand.vmem [shape: f32[2,32,8], index: 9, kind: output, shape index: {}]  }
   0x1 LB: > { %s2388_s10 = sadd.s32 4294967295, %s2823_s30   ;;  %p2392_p0 = scmp.ge.s32.totalorder %s2823_s30, 1  ;;  %s2823_s30 = sphi %s2878_s30, %s19_s30  }
   0x2   : > { %p287_p1 = scmp.lt.s32.totalorder %s2823_s30, 3 }
   0x4   : > { %p288_p2 = pnand %p2392_p0, %p287_p1 }
   0x5   : > { %p323_p3 = scmp.lt.s32.totalorder (!%p288_p2), %s2388_s10, 1  ;;  %v369_v0 = vld [vmem:[%s3243_s1] sm:$0xff] (!%p288_p2)  ;;  %v370_v1 = vld [vmem:[%s3243_s1 + $0x8] sm:$0xff] (!%p288_p2)  ;;  %v2825_v3 = vmov (!%p288_p2), 0.0|0.0   ;;  %v371_v6 = vld [vmem:[%s3243_s1 + $0x10] sm:$0xff] (!%p288_p2)  ;;  %vm2826_vm0 = vmmov (!%p288_p2), 0  }
   0x6   : > { %291 = sbr.rel (%p288_p2) target bundleno = 1488 (0x5d0), region = 56  ;;  %v373_v2 = vld [vmem:[%s3243_s1 + $0x20] sm:$0xff] (!%p288_p2)  ;;  %2718 = vmatprep.subr.bf16.mxu0 (!%p288_p2), %v2825_v3  ;;  %2724 = vmatprep.subr.bf16.mxu1 (!%p288_p2), %v2825_v3  ;;  %v2719_v4 = vpack.c.bf16 (!%p288_p2), %v370_v1, %v369_v0  ;;  %v374_v5 = vld [vmem:[%s3243_s1 + $0x28] sm:$0xff] (!%p288_p2)  ;;  %v372_v7 = vld [vmem:[%s3243_s1 + $0x18] sm:$0xff] (!%p288_p2)  ;;  %v2827_v11 = vmov (!%p288_p2), 0.0   ;;  %vm413_vm1 = vcmask (!%p288_p2), 261120  }
   0x7   : > { %v2725_v8 = vpack.c.bf16 (!%p288_p2), %v374_v5, %v373_v2  ;;  %v375_v9 = vld [vmem:[%s3243_s1 + $0x30] sm:$0xff] (!%p288_p2)  ;;  %v376_v10 = vld [vmem:[%s3243_s1 + $0x38] sm:$0xff] (!%p288_p2)  ;;  %2534 = vmatprep.mubr.msk.f32.mxu0 (!%p288_p2), %vm2826_vm0, %v2827_v11  ;;  %2545 = vmatprep.mubr.msk.f32.mxu1 (!%p288_p2), %vm2826_vm0, %v2827_v11  ;;  %v2722_v12 = vpack.c.bf16 (!%p288_p2), %v372_v7, %v371_v6  ;;  %v377_v18 = vld [vmem:[%s3243_s1 + $0x40] sm:$0xff] (!%p288_p2)  ;;  %vm1345_vm2 = vcmask (!%p288_p2), 64512  }
   0x8   : > { %2720 = vmatpush3.bf16.msra.mxu0 (!%p288_p2), %v2719_v4  ;;  %v2728_v13 = vpack.c.bf16 (!%p288_p2), %v376_v10, %v375_v9  ;;  %v378_v19 = vld [vmem:[%s3243_s1 + $0x48] sm:$0xff] (!%p288_p2)  ;;  %v381_v20 = vld [vmem:[%s3243_s1 + $0x60] sm:$0xff] (!%p288_p2)  ;;  %v379_v24 = vld [vmem:[%s3243_s1 + $0x50] sm:$0xff] (!%p288_p2) }
   0x9   : > { %2726 = vmatpush3.bf16.msra.mxu1 (!%p288_p2), %v2725_v8  ;;  %2721 = vmatprep.subr.bf16.mxu0 (!%p288_p2), %v2825_v3  ;;  %v382_v21 = vld [vmem:[%s3243_s1 + $0x68] sm:$0xff] (!%p288_p2)  ;;  %v2731_v22 = vpack.c.bf16 (!%p288_p2), %v378_v19, %v377_v18  ;;  %v380_v25 = vld [vmem:[%s3243_s1 + $0x58] sm:$0xff] (!%p288_p2)  ;;  %v383_v26 = vld [vmem:[%s3243_s1 + $0x70] sm:$0xff] (!%p288_p2) }
   0xa   : > { %2727 = vmatprep.subr.bf16.mxu1 (!%p288_p2), %v2825_v3  ;;  %v2737_v23 = vpack.c.bf16 (!%p288_p2), %v382_v21, %v381_v20  ;;  %v384_v27 = vld [vmem:[%s3243_s1 + $0x78] sm:$0xff] (!%p288_p2)  ;;  %v2734_v29 = vpack.c.bf16 (!%p288_p2), %v380_v25, %v379_v24  ;;  %v697_v31 = vld [vmem:[%s3244_s2] sm:$0xff] (!%p288_p2)  ;;  %v698_v32 = vld [vmem:[%s3244_s2 + $0x8] sm:$0xff] (!%p288_p2) }
   0xb   : > { %v2740_v30 = vpack.c.bf16 (!%p288_p2), %v384_v27, %v383_v26  ;;  %v701_v33 = vld [vmem:[%s3244_s2 + $0x20] sm:$0xff] (!%p288_p2)  ;;  %v702_v34 = vld [vmem:[%s3244_s2 + $0x28] sm:$0xff] (!%p288_p2)  ;;  %v2743_v35 = vpack.c.bf16 (!%p288_p2), %v698_v32, %v697_v31  ;;  %v699_v37 = vld [vmem:[%s3244_s2 + $0x10] sm:$0xff] (!%p288_p2) }
   0xc   : > { %2723 = vmatpush3.bf16.msra.mxu0 (!%p288_p2), %v2722_v12  ;;  %v2749_v36 = vpack.c.bf16 (!%p288_p2), %v702_v34, %v701_v33  ;;  %v700_v38 = vld [vmem:[%s3244_s2 + $0x18] sm:$0xff] (!%p288_p2)  ;;  %v703_v39 = vld [vmem:[%s3244_s2 + $0x30] sm:$0xff] (!%p288_p2)  ;;  %v705_v43 = vld [vmem:[%s3244_s2 + $0x40] sm:$0xff] (!%p288_p2) }
   0xd   : > { %s3253_s10 = smov (!%p323_p3, %s2388_s10), 1  ;;  %2729 = vmatpush3.bf16.msra.mxu1 %v2728_v13  ;;  %2730 = vmatprep.subr.bf16.mxu0 %v2825_v3  ;;  %v704_v40 = vld [vmem:[%s3244_s2 + $0x38] sm:$0xff]  ;;  %v2746_v41 = vpack.c.bf16 %v700_v38, %v699_v37  ;;  %v706_v44 = vld [vmem:[%s3244_s2 + $0x48] sm:$0xff]  ;;  %v709_v45 = vld [vmem:[%s3244_s2 + $0x60] sm:$0xff] }
   0xe   : > { %s2440_s27 = sshll.u32 %s3253_s10, 5  ;;  %2736 = vmatprep.subr.bf16.mxu1 %v2825_v3  ;;  %v2752_v42 = vpack.c.bf16 %v704_v40, %v703_v39  ;;  %v710_v46 = vld [vmem:[%s3244_s2 + $0x68] sm:$0xff]  ;;  %v2755_v47 = vpack.c.bf16 %v706_v44, %v705_v43  ;;  %v707_v49 = vld [vmem:[%s3244_s2 + $0x50] sm:$0xff]  ;;  %v708_v50 = vld [vmem:[%s3244_s2 + $0x58] sm:$0xff] }
   0xf   : > { %s327_s11 = scalar_lea.vmem %s3242_s0, %s2440_s27  ;;  %v2761_v48 = vpack.c.bf16 %v710_v46, %v709_v45  ;;  %v711_v51 = vld [vmem:[%s3244_s2 + $0x70] sm:$0xff]  ;;  %v712_v52 = vld [vmem:[%s3244_s2 + $0x78] sm:$0xff]  ;;  %v2758_v53 = vpack.c.bf16 %v708_v50, %v707_v49  ;;  %v1021_v55 = vld [vmem:[%s3245_s3] sm:$0xff]  ;;  %s332_s20 = scalar_lea.vmem %s3251_s9, %s2440_s27 }
  0x10   : > { %v333_v14 = vld [vmem:[%s327_s11] sm:$0xff]  ;;  %v334_v15 = vld [vmem:[%s327_s11 + $0x8] sm:$0xff]  ;;  %v335_v16 = vld [vmem:[%s327_s11 + $0x10] sm:$0xff]  ;;  %v2764_v54 = vpack.c.bf16 %v712_v52, %v711_v51 }
  0x11   : > { %337 = vxpose.xlu0.b32.start [1/4] (short) (narrow) %v333_v14, 8  ;;  %v336_v17 = vld [vmem:[%s327_s11 + $0x18] sm:$0xff]  ;;  %v1022_v56 = vld [vmem:[%s3245_s3 + $0x8] sm:$0xff]  ;;  %v1025_v57 = vld [vmem:[%s3245_s3 + $0x20] sm:$0xff] }
  0x12   : > { %v1026_v58 = vld [vmem:[%s3245_s3 + $0x28] sm:$0xff]  ;;  %v2767_v59 = vpack.c.bf16 %v1022_v56, %v1021_v55  ;;  %v1023_v61 = vld [vmem:[%s3245_s3 + $0x10] sm:$0xff]  ;;  %v1024_v62 = vld [vmem:[%s3245_s3 + $0x18] sm:$0xff] }
  0x13   : > { %v2773_v60 = vpack.c.bf16 %v1026_v58, %v1025_v57  ;;  %v1027_v63 = vld [vmem:[%s3245_s3 + $0x30] sm:$0xff]  ;;  %v1028_v0 = vld [vmem:[%s3245_s3 + $0x38] sm:$0xff]  ;;  %v2770_v1 = vpack.c.bf16 %v1024_v62, %v1023_v61  ;;  %v1029_v4 = vld [vmem:[%s3245_s3 + $0x40] sm:$0xff] }
  0x14   : > { %v2776_v2 = vpack.c.bf16 %v1028_v0, %v1027_v63  ;;  %v1030_v5 = vld [vmem:[%s3245_s3 + $0x48] sm:$0xff]  ;;  %v1033_v6 = vld [vmem:[%s3245_s3 + $0x60] sm:$0xff]  ;;  %v1031_v10 = vld [vmem:[%s3245_s3 + $0x50] sm:$0xff] }
  0x15   : > { %338 = vxpose.xlu0.b32.cont [2/4] (short) (narrow) %v334_v15, 8  ;;  %v1034_v7 = vld [vmem:[%s3245_s3 + $0x68] sm:$0xff]  ;;  %v2779_v8 = vpack.c.bf16 %v1030_v5, %v1029_v4  ;;  %v1032_v12 = vld [vmem:[%s3245_s3 + $0x58] sm:$0xff]  ;;  %v1035_v13 = vld [vmem:[%s3245_s3 + $0x70] sm:$0xff] }
  0x16   : > { %v2785_v9 = vpack.c.bf16 %v1034_v7, %v1033_v6  ;;  %v1036_v14 = vld [vmem:[%s3245_s3 + $0x78] sm:$0xff]  ;;  %v2782_v15 = vpack.c.bf16 %v1032_v12, %v1031_v10  ;;  %v2405_v24 = vld [vmem:[%s3247_s5] ss:$0 sm:$0xff]  ;;  %v2406_v25 = vld [vmem:[%s3247_s5 + $0x1] ss:$0 sm:$0xff] }
  0x17   : > { %v2408_v37 = vld [vmem:[%s3247_s5 + $0x3] ss:$0 sm:$0xff]  ;;  %v2399_v40 = vld [vmem:[%s3246_s4 + $0x2] ss:$0 sm:$0xff]  ;;  %v2414_v49 = vld [vmem:[%s3248_s6 + $0x1] ss:$0 sm:$0xff] }
  0x19   : > { %339 = vxpose.xlu0.b32.cont [3/4] (short) (narrow) %v335_v16, 8  ;;  %v2788_v16 = vpack.c.bf16 %v1036_v14, %v1035_v13 }
  0x1d   : > { %340 = vxpose.xlu0.b32.end [4/4] (short) (narrow) %v336_v17, 8 }
  0x91   : > { %v2952_v28 = vpop.trf.xlu0 }
  0x92   : > { %2535 = vmatmul.mubr.msk.f32.vlgmr.msra.gmra.mrb[0].mxu0 %vm413_vm1, %v2952_v28  ;;  %2546 = vmatmul.mubr.msk.f32.vlgmr.msra.gmra.mrb[0].mxu1 %vm413_vm1, %v2952_v28 }
  0x93   : > { %2732 = vmatpush3.bf16.msra.mxu0 %v2731_v22  ;;  %2738 = vmatpush3.bf16.msra.mxu1 %v2737_v23 }
  0x94   : > { %2733 = vmatprep.subr.bf16.mxu0 %v2825_v3  ;;  %2739 = vmatprep.subr.bf16.mxu1 %v2825_v3 }
  0x95   : > { %2556 = vmatprep.mubr.msk.f32.mxu0 %vm2826_vm0, %v2827_v11  ;;  %2567 = vmatprep.mubr.msk.f32.mxu1 %vm2826_vm0, %v2827_v11 }
  0x97   : > { %2735 = vmatpush3.bf16.msra.mxu0 %v2734_v29  ;;  %2741 = vmatpush3.bf16.msra.mxu1 %v2740_v30  ;;  %v2398_v29 = vld [vmem:[%s3246_s4 + $0x1] ss:$0 sm:$0xff] }
  0x98   : > { %2742 = vmatprep.subr.bf16.mxu0 %v2825_v3  ;;  %2748 = vmatprep.subr.bf16.mxu1 %v2825_v3 }
  0x9a   : > { %2557 = vmatmul.mubr.msk.f32.vlgmr.msra.gmra.mrb[2].mxu0 %vm413_vm1, %v2952_v28  ;;  %2568 = vmatmul.mubr.msk.f32.vlgmr.msra.gmra.mrb[2].mxu1 %vm413_vm1, %v2952_v28 }
  0x9b   : > { %2744 = vmatpush3.bf16.msra.mxu0 %v2743_v35  ;;  %2750 = vmatpush3.bf16.msra.mxu1 %v2749_v36  ;;  %v2407_v36 = vld [vmem:[%s3247_s5 + $0x2] ss:$0 sm:$0xff] }
  0x9c   : > { %2745 = vmatprep.subr.bf16.mxu0 %v2825_v3  ;;  %2751 = vmatprep.subr.bf16.mxu1 %v2825_v3 }
  0x9d   : > { %2578 = vmatprep.mubr.msk.f32.mxu0 %vm2826_vm0, %v2827_v11  ;;  %2589 = vmatprep.mubr.msk.f32.mxu1 %vm2826_vm0, %v2827_v11 }
  0x9f   : > { %2747 = vmatpush3.bf16.msra.mxu0 %v2746_v41  ;;  %2753 = vmatpush3.bf16.msra.mxu1 %v2752_v42  ;;  %v2400_v41 = vld [vmem:[%s3246_s4 + $0x3] ss:$0 sm:$0xff] }
  0xa0   : > { %2754 = vmatprep.subr.bf16.mxu0 %v2825_v3  ;;  %2760 = vmatprep.subr.bf16.mxu1 %v2825_v3 }
  0xa2   : > { %2579 = vmatmul.mubr.msk.f32.vlgmr.msra.gmra.mrb[4].mxu0 %vm413_vm1, %v2952_v28  ;;  %2590 = vmatmul.mubr.msk.f32.vlgmr.msra.gmra.mrb[4].mxu1 %vm413_vm1, %v2952_v28 }
  0xa3   : > { %2756 = vmatpush3.bf16.msra.mxu0 %v2755_v47  ;;  %2762 = vmatpush3.bf16.msra.mxu1 %v2761_v48  ;;  %v2413_v48 = vld [vmem:[%s3248_s6] ss:$0 sm:$0xff] }
  0xa4   : > { %2757 = vmatprep.subr.bf16.mxu0 %v2825_v3  ;;  %2763 = vmatprep.subr.bf16.mxu1 %v2825_v3 }
  0xa5   : > { %2600 = vmatprep.mubr.msk.f32.mxu0 %vm2826_vm0, %v2827_v11  ;;  %2611 = vmatprep.mubr.msk.f32.mxu1 %vm2826_vm0, %v2827_v11 }
  0xa7   : > { %2759 = vmatpush3.bf16.msra.mxu0 %v2758_v53  ;;  %2765 = vmatpush3.bf16.msra.mxu1 %v2764_v54 }
  0xa8   : > { %2766 = vmatprep.subr.bf16.mxu0 %v2825_v3  ;;  %2772 = vmatprep.subr.bf16.mxu1 %v2825_v3 }
  0xaa   : > { %2601 = vmatmul.mubr.msk.f32.vlgmr.msra.gmra.mrb[6].mxu0 %vm413_vm1, %v2952_v28  ;;  %2612 = vmatmul.mubr.msk.f32.vlgmr.msra.gmra.mrb[6].mxu1 %vm413_vm1, %v2952_v28 }
  0xab   : > { %2768 = vmatpush3.bf16.msra.mxu0 %v2767_v59  ;;  %2774 = vmatpush3.bf16.msra.mxu1 %v2773_v60 }
  0xac   : > { %2769 = vmatprep.subr.bf16.mxu0 %v2825_v3  ;;  %2775 = vmatprep.subr.bf16.mxu1 %v2825_v3 }
  0xad   : > { %2622 = vmatprep.mubr.msk.f32.mxu0 %vm2826_vm0, %v2827_v11  ;;  %2633 = vmatprep.mubr.msk.f32.mxu1 %vm2826_vm0, %v2827_v11 }
  0xaf   : > { %2771 = vmatpush3.bf16.msra.mxu0 %v2770_v1  ;;  %2777 = vmatpush3.bf16.msra.mxu1 %v2776_v2 }
  0xb0   : > { %2778 = vmatprep.subr.bf16.mxu0 %v2825_v3  ;;  %2784 = vmatprep.subr.bf16.mxu1 %v2825_v3 }
  0xb2   : > { %2623 = vmatmul.mubr.msk.f32.vlgmr.msra.gmra.mrb[8].mxu0 %vm413_vm1, %v2952_v28  ;;  %2634 = vmatmul.mubr.msk.f32.vlgmr.msra.gmra.mrb[8].mxu1 %vm413_vm1, %v2952_v28 }
  0xb3   : > { %2780 = vmatpush3.bf16.msra.mxu0 %v2779_v8  ;;  %2786 = vmatpush3.bf16.msra.mxu1 %v2785_v9 }
  0xb4   : > { %2781 = vmatprep.subr.bf16.mxu0 %v2825_v3  ;;  %2787 = vmatprep.subr.bf16.mxu1 %v2825_v3 }
  0xb5   : > { %2644 = vmatprep.mubr.msk.f32.mxu0 %vm2826_vm0, %v2827_v11  ;;  %2655 = vmatprep.mubr.msk.f32.mxu1 %vm2826_vm0, %v2827_v11 }
  0xb7   : > { %2783 = vmatpush3.bf16.msra.mxu0 %v2782_v15  ;;  %2789 = vmatpush3.bf16.msra.mxu1 %v2788_v16 }
  0xb8   : > { %2658 = vmatprep.subr.mxu0 %v2827_v11  ;;  %2663 = vmatprep.subr.mxu1 %v2827_v11 }
  0xba   : > { %2645 = vmatmul.mubr.msk.f32.vlgmr.msra.gmra.mrb[10].mxu0 %vm413_vm1, %v2952_v28  ;;  %2656 = vmatmul.mubr.msk.f32.vlgmr.msra.gmra.mrb[10].mxu1 %vm413_vm1, %v2952_v28  ;;  %v2397_v28 = vld [vmem:[%s3246_s4] ss:$0 sm:$0xff] }
  0xbb   : > { %2660 = vmatprep.mubr.msk.f32.mxu0 %vm2826_vm0, %v2827_v11  ;;  %2665 = vmatprep.mubr.msk.f32.mxu1 %vm2826_vm0, %v2827_v11 }
 0x165   : > { %v483_v3 = vpop.f32.mrb[0].mxu0  ;;  %v553_v17 = vpop.f32.mrb[0].mxu1 }
 0x166   : > { %v2536_v18 = vpop.f32.mrb[1].mxu0  ;;  %v2547_v19 = vpop.f32.mrb[1].mxu1  ;;  %v484_v34 = vadd.f32 %v2397_v28, %v483_v3  ;;  %v554_v35 = vadd.f32 %v2398_v29, %v553_v17 }
 0x16d   : > { %v623_v20 = vpop.f32.mrb[2].mxu0  ;;  %v693_v21 = vpop.f32.mrb[2].mxu1 }
 0x16e   : > { %v2558_v22 = vpop.f32.mrb[3].mxu0  ;;  %v2569_v23 = vpop.f32.mrb[3].mxu1  ;;  %v624_v46 = vadd.f32 %v2399_v40, %v623_v20  ;;  %v694_v47 = vadd.f32 %v2400_v41, %v693_v21 }
 0x175   : > { %v807_v26 = vpop.f32.mrb[4].mxu0  ;;  %v877_v27 = vpop.f32.mrb[4].mxu1 }
 0x176   : > { %v808_v30 = vadd.f32 %v2405_v24, %v807_v26  ;;  %v878_v31 = vadd.f32 %v2406_v25, %v877_v27  ;;  %v2580_v32 = vpop.f32.mrb[5].mxu0  ;;  %v2591_v33 = vpop.f32.mrb[5].mxu1 }
 0x177   : > { %v2415_v32 = vld [vmem:[%s3248_s6 + $0x2] ss:$0 sm:$0xff] }
 0x178   : > { %2659 = vmatpush3.xpose.msk.msra.mxu0 %vm1345_vm2, %v808_v30  ;;  %2664 = vmatpush3.xpose.msk.msra.mxu1 %vm1345_vm2, %v878_v31 }
 0x179   : > { %2668 = vmatprep.subr.mxu0 %v2827_v11  ;;  %2673 = vmatprep.subr.mxu1 %v2827_v11 }
 0x17b   : > { %2661 = vmatmul.mubr.msk.f32.vlgmr.msra.gmra.mrb[12].mxu0 %vm1345_vm2, %v484_v34  ;;  %2666 = vmatmul.mubr.msk.f32.vlgmr.msra.gmra.mrb[12].mxu1 %vm1345_vm2, %v554_v35 }
 0x17c   : > { %2670 = vmatprep.mubr.msk.f32.mxu0 %vm2826_vm0, %v2827_v11  ;;  %2675 = vmatprep.mubr.msk.f32.mxu1 %vm2826_vm0, %v2827_v11 }
 0x17d   : > { %v947_v38 = vpop.f32.mrb[6].mxu0  ;;  %v1017_v39 = vpop.f32.mrb[6].mxu1 }
 0x17e   : > { %v948_v42 = vadd.f32 %v2407_v36, %v947_v38  ;;  %v1018_v43 = vadd.f32 %v2408_v37, %v1017_v39  ;;  %v2602_v44 = vpop.f32.mrb[7].mxu0  ;;  %v2613_v45 = vpop.f32.mrb[7].mxu1  ;;  %v2416_v37 = vld [vmem:[%s3248_s6 + $0x3] ss:$0 sm:$0xff] }
 0x17f   : > { %v1986_v45 = vld [vmem:[%s3249_s7] sm:$0xff] }
 0x180   : > { %2669 = vmatpush3.xpose.msk.msra.mxu0 %vm1345_vm2, %v948_v42  ;;  %2674 = vmatpush3.xpose.msk.msra.mxu1 %vm1345_vm2, %v1018_v43 }
 0x181   : > { %2678 = vmatprep.subr.mxu0 %v2827_v11  ;;  %2683 = vmatprep.subr.mxu1 %v2827_v11 }
 0x183   : > { %2671 = vmatmul.mubr.msk.f32.vlgmr.msra.gmra.mrb[14].mxu0 %vm1345_vm2, %v624_v46  ;;  %2676 = vmatmul.mubr.msk.f32.vlgmr.msra.gmra.mrb[14].mxu1 %vm1345_vm2, %v694_v47  ;;  %v1987_v46 = vld [vmem:[%s3249_s7 + $0x8] sm:$0xff]  ;;  %v1988_v47 = vld [vmem:[%s3249_s7 + $0x10] sm:$0xff] }
 0x184   : > { %2680 = vmatprep.mubr.msk.f32.mxu0 %vm2826_vm0, %v2827_v11  ;;  %2685 = vmatprep.mubr.msk.f32.mxu1 %vm2826_vm0, %v2827_v11 }
 0x185   : > { %v1131_v50 = vpop.f32.mrb[8].mxu0  ;;  %v1201_v51 = vpop.f32.mrb[8].mxu1 }
 0x186   : > { %v1132_v52 = vadd.f32 %v2413_v48, %v1131_v50  ;;  %v1202_v53 = vadd.f32 %v2414_v49, %v1201_v51  ;;  %v2624_v54 = vpop.f32.mrb[9].mxu0  ;;  %v2635_v55 = vpop.f32.mrb[9].mxu1  ;;  %v1989_v50 = vld [vmem:[%s3249_s7 + $0x18] sm:$0xff] }
 0x188   : > { %2679 = vmatpush3.msra.mxu0 %v1132_v52  ;;  %2684 = vmatpush3.msra.mxu1 %v1202_v53 }
 0x189   : > { %2688 = vmatprep.subr.mxu0 %v2827_v11  ;;  %2693 = vmatprep.subr.mxu1 %v2827_v11 }
 0x18d   : > { %v1271_v56 = vpop.f32.mrb[10].mxu0  ;;  %v3170_v57 = vpop.f32.mrb[10].mxu1 }
 0x18e   : > { %v2646_v58 = vpop.f32.mrb[11].mxu0  ;;  %v2657_v59 = vpop.f32.mrb[11].mxu1  ;;  %v1272_v36 = vadd.f32 %v2415_v32, %v1271_v56  ;;  %v1342_v40 = vadd.f32 %v2416_v37, %v3170_v57 }
 0x24e   : > { %v1418_v60 = vpop.f32.mrb[12].mxu0  ;;  %v1494_v61 = vpop.f32.mrb[12].mxu1 }
 0x24f   : > { %v2662_v62 = vpop.f32.mrb[13].mxu0  ;;  %v2667_v63 = vpop.f32.mrb[13].mxu1  ;;  %v1650_v0 = vsel %vm1345_vm2, %v1418_v60, -inf  ;;  %v1653_v1 = vsel %vm1345_vm2, %v1494_v61, -inf }
 0x250   : > { %1651 = vmax.xlane.f32.xlu1 %v1650_v0 }
 0x254   : > { %1654 = vmax.xlane.f32.xlu1 %v1653_v1 }
 0x256   : > { %v1570_v2 = vpop.f32.mrb[14].mxu0  ;;  %v1646_v4 = vpop.f32.mrb[14].mxu1 }
 0x257   : > { %v2672_v5 = vpop.f32.mrb[15].mxu0  ;;  %v2677_v6 = vpop.f32.mrb[15].mxu1  ;;  %v1656_v7 = vsel %vm1345_vm2, %v1570_v2, -inf  ;;  %v1659_v8 = vsel %vm1345_vm2, %v1646_v4, -inf }
 0x258   : > { %1657 = vmax.xlane.f32.xlu1 %v1656_v7  ;;  %v2437_v7 = vld [vmem:[%s3250_s8] ss:$0 sm:$0xff] }
 0x25c   : > { %1660 = vmax.xlane.f32.xlu1 %v1659_v8 }
 0x2dd   : > { %v1652_v9 = vpop.xlane.xlu1 %1651 }
 0x2de   : > { %v1662_v10 = vsub.f32 %v1418_v60, %v1652_v9 }
 0x2e0   : > { %v1666_v12 = vmul.f32 1.442695, %v1662_v10 }
 0x2e1   : > { %v1655_v13 = vpop.xlane.xlu1 %1654 }
 0x2e2   : > { %2801 = vpow2.f32 %v1666_v12  ;;  %v1663_v14 = vsub.f32 %v1494_v61, %v1655_v13 }
 0x2e4   : > { %v1668_v15 = vmul.f32 1.442695, %v1663_v14 }
 0x2e5   : > { %v1658_v16 = vpop.xlane.xlu1 %1657 }
 0x2e6   : > { %2803 = vpow2.f32 %v1668_v15  ;;  %v1664_v3 = vsub.f32 %v1570_v2, %v1658_v16 }
 0x2e8   : > { %v1670_v17 = vmul.f32 1.442695, %v1664_v3 }
 0x2e9   : > { %v1661_v18 = vpop.xlane.xlu1 %1660 }
 0x2ea   : > { %2805 = vpow2.f32 %v1670_v17  ;;  %v1665_v19 = vsub.f32 %v1646_v4, %v1661_v18 }
 0x2ec   : > { %v2802_v20 = vpop.eup %2801  ;;  %v1672_v21 = vmul.f32 1.442695, %v1665_v19 }
 0x2ed   : > { %v1674_v22 = vsel %vm1345_vm2, %v2802_v20, 0.0 }
 0x2ee   : > { %2807 = vpow2.f32 %v1672_v21  ;;  %1675 = vadd.xlane.f32.xlu0 %v1674_v22 }
 0x2f0   : > { %v2804_v23 = vpop.eup %2803 }
 0x2f1   : > { %v1677_v24 = vsel %vm1345_vm2, %v2804_v23, 0.0 }
 0x2f2   : > { %1678 = vadd.xlane.f32.xlu1 %v1677_v24 }
 0x2f4   : > { %v2806_v25 = vpop.eup %2805 }
 0x2f5   : > { %v1680_v26 = vsel %vm1345_vm2, %v2806_v25, 0.0 }
 0x2f6   : > { %1681 = vadd.xlane.f32.xlu1 %v1680_v26 }
 0x2f8   : > { %v2808_v27 = vpop.eup %2807 }
 0x2f9   : > { %v1683_v28 = vsel %vm1345_vm2, %v2808_v27, 0.0 }
 0x2fa   : > { %1684 = vadd.xlane.f32.xlu1 %v1683_v28 }
 0x37b   : > { %v1676_v29 = vpop.xlane.xlu0 %1675 }
 0x37c   : > { %2809 = vrcp.f32 %v1676_v29 }
 0x37f   : > { %v1679_v30 = vpop.xlane.xlu1 %1678 }
 0x380   : > { %2811 = vrcp.f32 %v1679_v30 }
 0x383   : > { %v1682_v31 = vpop.xlane.xlu1 %1681 }
 0x384   : > { %2813 = vrcp.f32 %v1682_v31 }
 0x386   : > { %v2810_v33 = vpop.eup %2809 }
 0x387   : > { %v1690_v34 = vmul.f32 %v2810_v33, %v2802_v20  ;;  %v1685_v35 = vpop.xlane.xlu1 %1684 }
 0x388   : > { %2815 = vrcp.f32 %v1685_v35 }
 0x389   : > { %2681 = vmatmul.mubr.msk.f32.vlgmr.msra.gmra.mrb[16].mxu0 %vm1345_vm2, %v1690_v34 }
 0x38a   : > { %v2812_v38 = vpop.eup %2811  ;;  %2689 = vmatpush3.msra.mxu0 %v1272_v36  ;;  %2690 = vmatprep.mubr.msk.f32.mxu0 %vm2826_vm0, %v2827_v11 }
 0x38b   : > { %v1691_v39 = vmul.f32 %v2812_v38, %v2804_v23  ;;  %2698 = vmatprep.subr.mxu0 %v2827_v11 }
 0x38d   : > { %2686 = vmatmul.mubr.msk.f32.vlgmr.msra.gmra.mrb[16].mxu1 %vm1345_vm2, %v1691_v39 }
 0x38e   : > { %v2814_v41 = vpop.eup %2813  ;;  %2694 = vmatpush3.msra.mxu1 %v1342_v40  ;;  %2695 = vmatprep.mubr.msk.f32.mxu1 %vm2826_vm0, %v2827_v11 }
 0x38f   : > { %v1692_v42 = vmul.f32 %v2814_v41, %v2806_v25  ;;  %2703 = vmatprep.subr.mxu1 %v2827_v11 }
 0x391   : > { %2691 = vmatmul.mubr.msk.f32.vlgmr.msra.gmra.mrb[18].mxu0 %vm1345_vm2, %v1692_v42 }
 0x392   : > { %v2816_v43 = vpop.eup %2815  ;;  %2700 = vmatprep.mubr.msk.f32.mxu0 %vm2826_vm0, %v2827_v11  ;;  %2699 = vmatpush3.msra.mxu0 %v1986_v45 }
 0x393   : > { %v1693_v44 = vmul.f32 %v2816_v43, %v2808_v27  ;;  %2708 = vmatprep.subr.mxu0 %v2827_v11 }
 0x395   : > { %2696 = vmatmul.mubr.msk.f32.vlgmr.msra.gmra.mrb[18].mxu1 %vm1345_vm2, %v1693_v44 }
 0x396   : > { %2705 = vmatprep.mubr.msk.f32.mxu1 %vm2826_vm0, %v2827_v11  ;;  %2704 = vmatpush3.msra.mxu1 %v1987_v46 }
 0x397   : > { %2713 = vmatprep.subr.mxu1 %v2827_v11 }
 0x45c   : > { %v1763_v48 = vpop.f32.mrb[16].mxu0 }
 0x45d   : > { %v2682_v49 = vpop.f32.mrb[17].mxu0  ;;  %2701 = vmatmul.mubr.msk.f32.vlgmr.msra.gmra.mrb[20].mxu0 %vm1345_vm2, %v1763_v48 }
 0x45e   : > { %2709 = vmatpush3.msra.mxu0 %v1988_v47  ;;  %2710 = vmatprep.mubr.msk.f32.mxu0 %vm2826_vm0, %v2827_v11 }
 0x460   : > { %v1836_v51 = vpop.f32.mrb[16].mxu1 }
 0x461   : > { %v2687_v52 = vpop.f32.mrb[17].mxu1  ;;  %2706 = vmatmul.mubr.msk.f32.vlgmr.msra.gmra.mrb[20].mxu1 %vm1345_vm2, %v1836_v51 }
 0x462   : > { %2714 = vmatpush3.msra.mxu1 %v1989_v50  ;;  %2715 = vmatprep.mubr.msk.f32.mxu1 %vm2826_vm0, %v2827_v11 }
 0x464   : > { %v1909_v53 = vpop.f32.mrb[18].mxu0 }
 0x465   : > { %v2692_v54 = vpop.f32.mrb[19].mxu0  ;;  %2711 = vmatmul.mubr.msk.f32.vlgmr.msra.gmra.mrb[22].mxu0 %vm1345_vm2, %v1909_v53 }
 0x468   : > { %v1982_v55 = vpop.f32.mrb[18].mxu1 }
 0x469   : > { %v2697_v56 = vpop.f32.mrb[19].mxu1  ;;  %2716 = vmatmul.mubr.msk.f32.vlgmr.msra.gmra.mrb[22].mxu1 %vm1345_vm2, %v1982_v55 }
 0x530   : > { %v2059_v57 = vpop.f32.mrb[20].mxu0 }
 0x531   : > { %v2702_v58 = vpop.f32.mrb[21].mxu0  ;;  %v2282_v60 = vsel %vm413_vm1, %v2059_v57, 0.0 }
 0x534   : > { %v2132_v59 = vpop.f32.mrb[20].mxu1 }
 0x535   : > { %v2283_v61 = vsel %vm413_vm1, %v2132_v59, 0.0  ;;  %v2707_v62 = vpop.f32.mrb[21].mxu1 }
 0x536   : > { %v2284_v63 = vadd.f32 %v2283_v61, %v2282_v60 }
 0x538   : > { %v2205_v0 = vpop.f32.mrb[22].mxu0 }
 0x539   : > { %v2285_v11 = vsel %vm413_vm1, %v2205_v0, 0.0  ;;  %v2712_v1 = vpop.f32.mrb[23].mxu0 }
 0x53a   : > { %v2286_v2 = vadd.f32 %v2285_v11, %v2284_v63 }
 0x53c   : > { %v2278_v4 = vpop.f32.mrb[22].mxu1 }
 0x53d   : > { %v2287_v5 = vsel %vm413_vm1, %v2278_v4, 0.0  ;;  %v2717_v6 = vpop.f32.mrb[23].mxu1 }
 0x53e   : > { %v2288_v8 = vadd.f32 %v2287_v5, %v2286_v2 }
 0x540   : > { %v2296_v9 = vadd.f32 %v2437_v7, %v2288_v8 }
 0x542   : > { %2297 = vxpose.xlu1.b32.start.end [1/1] (short) (narrow) %v2296_v9, 32 }
 0x5c2   : > { %v2313_v10 = vpop.trf.xlu1 }
 0x5c3   : > { %2329 = vst.msk [vmem:[%s332_s20] sm:$0xff] %vm1345_vm2, %v2313_v10 }
 0x5c6   : > { %v2314_v12 = vpop.trf.xlu1 }
 0x5c7   : > { %2330 = vst.msk [vmem:[%s332_s20 + $0x8] sm:$0xff] %vm1345_vm2, %v2314_v12 }
 0x5ca   : > { %v2315_v13 = vpop.trf.xlu1 }
 0x5cb   : > { %2331 = vst.msk [vmem:[%s332_s20 + $0x10] sm:$0xff] %vm1345_vm2, %v2315_v13 }
 0x5ce   : > { %v2316_v14 = vpop.trf.xlu1 }
 0x5cf   : > { %2332 = vst.msk [vmem:[%s332_s20 + $0x18] sm:$0xff] %vm1345_vm2, %v2316_v14 }
 0x5d0 PF: > { %s19_s30 = sadd.s32 1, %s2823_s30  }
 0x5d1   : > { %p16_p4 = scmp.ge.s32.totalorder %s19_s30, 4  }
 0x5d3   :  { %18 = sbr.rel (!%p16_p4) target bundleno = 1 (0x1), region = 86 }

</bundles_post_ra>
